<compile_context>
chip_gen: v7x
topology: tpu7x:2x2x1
jax: 0.10.0
libtpu: 0.0.40
codegen_flags: <defaults>
</compile_context>

<pallas_src>
import numpy as np
import jax
import jax.numpy as jnp
from jax.experimental import pallas as pl
from jax.experimental.pallas import tpu as pltpu


def _solar_scalars(days_since_j2000):
    """Scalar solar ephemeris (depends only on `time`, not the grid) — host glue."""
    d = float(days_since_j2000)
    g = np.deg2rad((357.529 + 0.98560028 * d) % 360.0)          # mean anomaly
    q = (280.459 + 0.98564736 * d) % 360.0                      # mean longitude
    lam = np.deg2rad((q + 1.915 * np.sin(g) + 0.020 * np.sin(2.0 * g)) % 360.0)
    eps = np.deg2rad(23.439 - 0.00000036 * d)                   # obliquity
    decl = np.arcsin(np.sin(eps) * np.sin(lam))                 # declination
    ra = np.arctan2(np.cos(eps) * np.sin(lam), np.cos(lam))     # right ascension
    gmst = np.deg2rad((280.46061837 + 360.98564736629 * d) % 360.0)
    gha = gmst - ra                                             # Greenwich hour angle (rad)
    return np.float32(np.sin(decl)), np.float32(np.cos(decl)), np.float32(gha)


def _cos_zenith(time_days, lons_deg, lats_deg):
    """Host numpy zenith-angle channel, mirroring makani's cos_zenith_angle."""
    lon_grid, lat_grid = np.meshgrid(lons_deg, lats_deg)        # (H, W)
    sin_dec, cos_dec, gha = _solar_scalars(time_days)
    lat_r = np.deg2rad(lat_grid)
    lon_r = np.deg2rad(lon_grid)
    cosz = np.sin(lat_r) * sin_dec + np.cos(lat_r) * cos_dec * np.cos(gha + lon_r)
    return cosz.astype(np.float32)                              # (H, W)


def _wrapper_kernel(x_ref, cosz_ref, w_ref, wz_ref, b_ref, o_ref):
    """One lane-tile per grid step (batch folded into lanes).

    x_ref    : VMEM f32[C, LT]        input channels for this lane tile
    cosz_ref : VMEM f32[1, LT]        zenith channel for this lane tile
    w_ref    : VMEM f32[CO_PAD, C]    model weight columns for the x channels
    wz_ref   : VMEM f32[CO_PAD, 1]    model weight column for the zenith channel
    b_ref    : VMEM f32[CO_PAD, 1]    model bias
    o_ref    : VMEM f32[CO_PAD, LT]
    """
    # MXU: W_x @ x  (f32 accumulate)
    out = jnp.dot(w_ref[...], x_ref[...], preferred_element_type=jnp.float32)
    # VPU broadcast FMA: zenith-channel contribution + bias (replaces torch.cat)
    out = out + wz_ref[...] * cosz_ref[...] + b_ref[...]
    o_ref[...] = out.astype(o_ref.dtype)


def model_wrapper_forward(x_nchw, time_days, lats_deg, lons_deg, weight, bias,
                          *, lane_tile=256):
    """ModelWrapper.forward with add_zenith=True.  x_nchw: f32[B, C, H, W]."""
    B, C, H, W = x_nchw.shape
    HW = H * W
    total = B * HW
    C_out = weight.shape[0]
    CO_PAD = ((C_out + 7) // 8) * 8          # sublane-full output rows

    # --- host glue: zenith channel (same place makani computes it) ---
    cosz = _cos_zenith(time_days, lons_deg, lats_deg)            # (H, W) f32
    cosz_lanes = jnp.asarray(np.tile(cosz.reshape(1, HW), (1, B)))  # (1, B*HW)

    # --- layout plumbing: fold batch into the lane axis ---
    x_lanes = jnp.transpose(x_nchw, (1, 0, 2, 3)).reshape(C, total)  # (C, B*HW)

    # --- split the 1x1-conv weight around the appended zenith channel, pad rows ---
    weight = weight.astype(jnp.float32)
    w_x = jnp.zeros((CO_PAD, C), jnp.float32).at[:C_out, :].set(weight[:, :C])
    w_z = jnp.zeros((CO_PAD, 1), jnp.float32).at[:C_out, :].set(weight[:, C:C + 1])
    b_p = jnp.zeros((CO_PAD, 1), jnp.float32).at[:C_out, :].set(
        bias.reshape(C_out, 1).astype(jnp.float32))

    # --- lane tiling: parallel grid axis (megacore on v7x, VMEM scaling knob) ---
    lt = min(lane_tile, total)
    assert lt % 128 == 0 and total % lt == 0, "lane tile must be a multiple of 128 dividing B*H*W"
    n_tiles = total // lt

    out = pl.pallas_call(
        _wrapper_kernel,
        out_shape=jax.ShapeDtypeStruct((CO_PAD, total), jnp.float32),
        grid=(n_tiles,),
        in_specs=[
            pl.BlockSpec((C, lt), lambda l: (0, l)),          # x lane tile
            pl.BlockSpec((1, lt), lambda l: (0, l)),          # zenith lane tile
            pl.BlockSpec((CO_PAD, C), lambda l: (0, 0)),      # W[:, :C]  (resident)
            pl.BlockSpec((CO_PAD, 1), lambda l: (0, 0)),      # W[:, C]   (resident)
            pl.BlockSpec((CO_PAD, 1), lambda l: (0, 0)),      # bias      (resident)
        ],
        out_specs=pl.BlockSpec((CO_PAD, lt), lambda l: (0, l)),
        compiler_params=pltpu.CompilerParams(dimension_semantics=("parallel",)),
    )(x_lanes, cosz_lanes, w_x, w_z, b_p)

    # --- layout plumbing back to NCHW; drop sublane padding ---
    out = out[:C_out].reshape(C_out, B, H, W)
    return jnp.transpose(out, (1, 0, 2, 3))


def _reference(x_nchw, time_days, lats_deg, lons_deg, weight, bias):
    """Pure numpy reference of the same forward (zenith channel broadcast over batch)."""
    x = np.asarray(x_nchw, dtype=np.float64)
    cosz = _cos_zenith(time_days, lons_deg, lats_deg).astype(np.float64)
    z = np.broadcast_to(cosz[None, None], (x.shape[0], 1) + cosz.shape)
    x_ext = np.concatenate([x, z], axis=1)                       # (B, C+1, H, W)
    w = np.asarray(weight, dtype=np.float64)
    b = np.asarray(bias, dtype=np.float64).reshape(1, -1, 1, 1)
    out = np.einsum("oc,bchw->bohw", w, x_ext) + b
    return out.astype(np.float32)


if __name__ == "__main__":
    B, C, H, W = 2, 4, 16, 16     # img_shape_x = H = 16, img_shape_y = W = 16
    C_out = 4

    key = jax.random.PRNGKey(0)
    kx, kw, kb = jax.random.split(key, 3)
    x = jax.random.normal(kx, (B, C, H, W), dtype=jnp.float32)
    weight = jax.random.normal(kw, (C_out, C + 1), dtype=jnp.float32) * 0.1
    bias = jax.random.normal(kb, (C_out, 1), dtype=jnp.float32) * 0.01

    # lat/lon grids exactly as in ModelWrapper.__init__
    lats = 90.0 - 180.0 * np.arange(H) / (H - 1)
    lons = 360.0 * np.arange(W) / W
    time_days = 8400.375          # fractional days since J2000 (synthetic "time")

    out = model_wrapper_forward(x, time_days, lats, lons, weight, bias)
    out = jax.block_until_ready(out)

    ref = _reference(np.asarray(x), time_days, lats, lons,
                     np.asarray(weight), np.asarray(bias))
    assert out.shape == (B, C_out, H, W)
    np.testing.assert_allclose(np.asarray(out), ref, rtol=1e-3, atol=1e-3)
    print("KERNEL_OK")
</pallas_src>

<mosaic_0001>
module attributes {stable_mosaic.version = 11 : i64} {
  func.func @_wrapper_kernel(%arg0: i32, %arg1: memref<4x256xf32, #tpu.memory_space<vmem>>, %arg2: memref<1x256xf32, #tpu.memory_space<vmem>>, %arg3: memref<8x4xf32, #tpu.memory_space<vmem>>, %arg4: memref<8x1xf32, #tpu.memory_space<vmem>>, %arg5: memref<8x1xf32, #tpu.memory_space<vmem>>, %arg6: memref<8x256xf32, #tpu.memory_space<vmem>>) attributes {dimension_semantics = [#tpu.dimension_semantics<parallel>], iteration_bounds = array<i64: 2>, scalar_prefetch = 0 : i64, scratch_operands = 0 : i64, tpu.core_type = #tpu.core_type<tc>, window_params = [{transform_indices = @transform_0, window_bounds = array<i64: 4, 256>}, {transform_indices = @transform_1, window_bounds = array<i64: 1, 256>}, {pipeline_mode = #tpu.pipeline_mode<synchronous>, transform_indices = @transform_2, window_bounds = array<i64: 8, 4>}, {pipeline_mode = #tpu.pipeline_mode<synchronous>, transform_indices = @transform_3, window_bounds = array<i64: 8, 1>}, {pipeline_mode = #tpu.pipeline_mode<synchronous>, transform_indices = @transform_4, window_bounds = array<i64: 8, 1>}, {transform_indices = @transform_5, window_bounds = array<i64: 8, 256>}]} {
    %c0 = arith.constant 0 : index
    %c0_0 = arith.constant 0 : index
    %0 = vector.load %arg3[%c0, %c0_0] : memref<8x4xf32, #tpu.memory_space<vmem>>, vector<8x4xf32>
    %c0_1 = arith.constant 0 : index
    %c0_2 = arith.constant 0 : index
    %1 = vector.load %arg1[%c0_1, %c0_2] : memref<4x256xf32, #tpu.memory_space<vmem>>, vector<4x256xf32>
    %cst = arith.constant dense<0.000000e+00> : vector<8x256xf32>
    %2 = tpu.matmul %0, %1, %cst {dimension_numbers = #tpu.dot_dimension_numbers<[1], [0], [0], [1], [0, 0, 1, 1], [], []>} : vector<8x4xf32>, vector<4x256xf32>, vector<8x256xf32> -> vector<8x256xf32>
    %c0_3 = arith.constant 0 : index
    %c0_4 = arith.constant 0 : index
    %3 = vector.load %arg4[%c0_3, %c0_4] : memref<8x1xf32, #tpu.memory_space<vmem>>, vector<8x1xf32>
    %c0_5 = arith.constant 0 : index
    %c0_6 = arith.constant 0 : index
    %4 = vector.load %arg2[%c0_5, %c0_6] : memref<1x256xf32, #tpu.memory_space<vmem>>, vector<1x256xf32>
    %5 = vector.broadcast %3 : vector<8x1xf32> to vector<8x256xf32>
    %6 = vector.broadcast %4 : vector<1x256xf32> to vector<8x256xf32>
    %7 = arith.mulf %5, %6 : vector<8x256xf32>
    %8 = arith.addf %2, %7 : vector<8x256xf32>
    %c0_7 = arith.constant 0 : index
    %c0_8 = arith.constant 0 : index
    %9 = vector.load %arg5[%c0_7, %c0_8] : memref<8x1xf32, #tpu.memory_space<vmem>>, vector<8x1xf32>
    %10 = vector.broadcast %9 : vector<8x1xf32> to vector<8x256xf32>
    %11 = arith.addf %8, %10 : vector<8x256xf32>
    %c0_9 = arith.constant 0 : index
    %c0_10 = arith.constant 0 : index
    %12 = vector.load %arg6[%c0_9, %c0_10] : memref<8x256xf32, #tpu.memory_space<vmem>>, vector<8x256xf32>
    tpu.vector_store %arg6[%c0_9, %c0_10], %11 {strides = array<i32>} : memref<8x256xf32, #tpu.memory_space<vmem>>, vector<8x256xf32>,
    return
  }
  func.func @transform_0(%arg0: i32) -> (i32, i32) {
    %c0_i32 = arith.constant 0 : i32
    %c0_i32_0 = arith.constant 0 : i32
    return %c0_i32, %arg0 : i32, i32
  }
  func.func @transform_1(%arg0: i32) -> (i32, i32) {
    %c0_i32 = arith.constant 0 : i32
    %c0_i32_0 = arith.constant 0 : i32
    return %c0_i32, %arg0 : i32, i32
  }
  func.func @transform_2(%arg0: i32) -> (i32, i32) {
    %c0_i32 = arith.constant 0 : i32
    %c0_i32_0 = arith.constant 0 : i32
    %c0_i32_1 = arith.constant 0 : i32
    return %c0_i32, %c0_i32_0 : i32, i32
  }
  func.func @transform_3(%arg0: i32) -> (i32, i32) {
    %c0_i32 = arith.constant 0 : i32
    %c0_i32_0 = arith.constant 0 : i32
    %c0_i32_1 = arith.constant 0 : i32
    return %c0_i32, %c0_i32_0 : i32, i32
  }
  func.func @transform_4(%arg0: i32) -> (i32, i32) {
    %c0_i32 = arith.constant 0 : i32
    %c0_i32_0 = arith.constant 0 : i32
    %c0_i32_1 = arith.constant 0 : i32
    return %c0_i32, %c0_i32_0 : i32, i32
  }
  func.func @transform_5(%arg0: i32) -> (i32, i32) {
    %c0_i32 = arith.constant 0 : i32
    %c0_i32_0 = arith.constant 0 : i32
    return %c0_i32, %arg0 : i32, i32
  }
}

</mosaic_0001>

<bundles_post_ra>
// kernel: tpu_custom_call.1
= control target key start
LH: loop header
LB: loop body
LE: loop exit
PB: predicated region body
PF: predicated region fallthrough
CT: control target
= control target key end

     0   :  { %10 = vsyncpa [#allocation3], 0  ;;  %s710_s0 = inlined_call_operand.vmem [shape: f32[4,512], index: 0, kind: input, shape index: {}]   ;;  %s711_s1 = inlined_call_operand.vmem [shape: f32[1,512], index: 1, kind: input, shape index: {}]   ;;  %s712_s2 = inlined_call_operand.vmem [shape: f32[8,4], index: 2, kind: input, shape index: {}]   ;;  %s713_s3 = inlined_call_operand.vmem [shape: f32[8,1], index: 3, kind: input, shape index: {}]   ;;  %s714_s4 = inlined_call_operand.vmem [shape: f32[8,1], index: 4, kind: input, shape index: {}]   ;;  %s715_s5 = inlined_call_operand.hbm [shape: f32[8,512], index: 5, kind: output, shape index: {}]  }
   0x1   :  { %12 = vsyncpa [#allocation3 + $0x1], 0  ;;  %s599_s18 = smov 0   ;;  %s601_s19 = smov 0  }
   0x2   :  { %s603_s20 = smov 0   ;;  %s605_s21 = smov 0  }
   0x3 LB: > { %s620_s22 = sadd.s32 4294967295, %s564_s21   ;;  %s442_s23 = sadd.s32 4294967294, %s564_s21   ;;  %s564_s21 = sphi %s605_s21, %s721_s21   ;;  %s560_s20 = sphi %s603_s20, %s720_s20   ;;  %s556_s19 = sphi %s601_s19, %s719_s19   ;;  %s552_s18 = sphi %s599_s18, %s718_s18  }
   0x4   : > { %s624_s24 = sadd.s32 1, %s564_s21   ;;  %s140_s25 = sadd.s32 1, %s560_s20 }
   0x5   : > { %s137_s26 = ssub.s32 %s564_s21, %s624_s24  ;;  %p150_p0 = scmp.ne.s32.totalorder %s560_s20, %s556_s19 }
   0x6   : > { %p138_p1 = scmp.eq.s32.totalorder %s137_s26, 0  ;;  %p151_p2 = scmp.eq.s32.totalorder %s620_s22, 1 }
   0x7   : > { %p156_p3 = scmp.ne.s32.totalorder %s556_s19, %s552_s18  ;;  %p157_p4 = scmp.eq.s32.totalorder %s442_s23, 1 }
   0x8   : > { %s635_s27 = scalar_select %p138_p1, %s560_s20, %s140_s25  }
   0x9   : > { %p637_p5 = por %p151_p2, %p150_p0  ;;  %p641_p6 = por %p157_p4, %p156_p3 }
   0xa   : > { %p445_p7 = scmp.ge.s32.totalorder %s564_s21, 1  ;;  %p201_p8 = scmp.lt.s32.totalorder %s564_s21, 3 }
   0xc   : > { %p202_p9 = pnand %p445_p7, %p201_p8 }
   0xd   : > { %s447_s30 = sshll.u32 (!%p202_p9), %s620_s22, 1  ;;  %v566_v0 = vmov (!%p202_p9), 0.0   ;;  %v567_v1 = vmov (!%p202_p9), 0   ;;  %v247_v2 = vld [vmem:[%s713_s3] sm:$0xff] (!%p202_p9)  ;;  %vm273_vm0 = vcmask (!%p202_p9), 1043456   ;;  %vm269_vm1 = vcmask (!%p202_p9), 31744  }
   0xe   : > { %205 = sbr.rel (%p202_p9) target bundleno = 260 (0x104), region = 40  ;;  %p234_p10 = scmp.lt.s32.totalorder (!%p202_p9), %s447_s30, 3  ;;  %342 = vmatprep.mubr.f32.mxu0 (!%p202_p9), %v566_v0  ;;  %500 = vset.pattern.permute.xlu0 (!%p202_p9), %v567_v1  ;;  %v349_v3 = vld [vmem:[%s714_s4] sm:$0xff] (!%p202_p9)  ;;  %v255_v7 = vlaneseq (!%p202_p9) }
   0xf   : > { %251 = vperm.xlu0 (!%p202_p9), %500, %v247_v2   ;;  %v245_v6 = vld [vmem:[%s712_s2] sm:$0xff] (!%p202_p9)  ;;  %s230_s25 = sand.u32 (!%p202_p9), 1, %s556_s19   ;;  %s458_s6 = sshll.u32 (!%p202_p9), %s620_s22, 8 }
  0x10   : > { %v256_v8 = vshrl.u32 (!%p202_p9), %v255_v7, 7  ;;  %s446_s26 = sshll.u32 (!%p202_p9), %s230_s25, 4  ;;  %s360_s11 = scalar_lea.sflag (!%p202_p9), [#allocation3], %s230_s25 }
  0x11   : > { %s232_s7 = scalar_lea.vmem (!%p202_p9), [#allocation2], %s446_s26  ;;  %s568_s12 = smov (!%p202_p9), [#allocation2]  }
  0x12   : > { %v257_v9 = vsub.s32 (!%p202_p9), 0, %v256_v8  ;;  %v261_v10 = vsub.s32 (!%p202_p9), 1, %v256_v8  ;;  %s374_s8 = sshll.u32 (!%p202_p9), %s232_s7, 4  ;;  %s670_s8 = int_to_ptr.vmem [resolvable:$true] %s374_s8 }
  0x13   : > { %352 = vperm.xlu0 (!%p202_p9), %500, %v349_v3   ;;  %s502_s22 = scalar_lea.vmem (!%p202_p9), %s670_s8, 256 }
  0x14   : > { %p503_p11 = scmp.ne.s32.totalorder (!%p202_p9), %s670_s8, %s502_s22 }
  0x15   : > { %s723_s30 = smov (!%p234_p10, %s447_s30), 3 }
  0x16   : > { %s448_s10 = sshll.u32 %s723_s30, 2  ;;  %s242_s23 = scalar_lea.vmem %s711_s1, %s723_s30 }
  0x17   : > { %s237_s13 = scalar_lea.vmem %s710_s0, %s448_s10  ;;  %v248_v11 = vld [vmem:[%s242_s23] sm:$0x3]  ;;  %s668_s10 = scalar_lea.hbm %s715_s5, %s458_s6 }
  0x18   : > { %v246_v4 = vld [vmem:[%s237_s13] sm:$0xff]  ;;  %v258_v12 = vrot.slane %v248_v11, %v257_v9  ;;  %v262_v13 = vrot.slane %v248_v11, %v261_v10  ;;  %p504_p12 = pnand %p503_p11, %p637_p5  ;;  %s506_s13 = sshll.u32 %s568_s12, 4  ;;  %s507_s13 = int_to_ptr.vmem [resolvable:$false] %s506_s13 }
  0x19   : > { %v268_v5 = vcombine.high %v246_v4, %v246_v4  ;;  %s508_s14 = scalar_lea.vmem %s507_s13, 512  ;;  %p509_p0 = scmp.lt.s32.totalorder %s670_s8, %s507_s13 }
  0x1a   : > { %p505_p13 = pneg %p504_p12  ;;  %p510_p1 = scmp.lt.s32.totalorder %s508_s14, %s502_s22 }
  0x1b   : > { %450 = vmatprep.subr.msk.mxu0 %vm273_vm0, %v268_v5 }
  0x1c   : > { %451 = vmatpush1.msk.msra.mxu0 %vm273_vm0, %v246_v4  ;;  %p511_p2 = por %p510_p1, %p509_p0 }
  0x1d   : > { %452 = vmatmul.mubr.msk.f32.vlgmr.msra.gmra.mrb[0].mxu0 %vm269_vm1, %v245_v6 }
  0x1e   : > { %p512_p3 = pnand %p511_p2, %p505_p13 }
  0x8e   : > { %v252_v14 = vpop.permute.xlu0 %251 }
  0x8f   : > { %v265_v15 = vmul.f32 %v258_v12, %v252_v14  ;;  %v266_v16 = vmul.f32 %v262_v13, %v252_v14 }
  0x92   : > { %v353_v20 = vpop.permute.xlu0 %352 }
  0xf0   : > { %v344_v17 = vpop.f32.mrb[0].mxu0 }
  0xf1   : > { %v345_v18 = vadd.f32 %v344_v17, %v265_v15  ;;  %v346_v19 = vpop.f32.mrb[1].mxu0 }
  0xf2   : > { %v347_v21 = vadd.f32 %v346_v19, %v266_v16 }
  0xf3   : > { %v355_v22 = vadd.f32 %v353_v20, %v345_v18 }
  0xf4   : > { %v356_v23 = vadd.f32 %v353_v20, %v347_v21 }
  0xf5   : > { %357 = vst [vmem:[%s232_s7] sm:$0xff] %v355_v22 }
  0xf6   : > { %358 = vst [vmem:[%s232_s7 + $0x8] sm:$0xff] %v356_v23 }
  0xf7   : > { %515 = shalt.err (!%p512_p3)
}
  0xf8   : > { %s516_s15 = scalar_lea.hbm %s668_s10, 256  ;;  %s520_s23 = scalar_lea.hbm %s715_s5, 512 }
  0xf9   : > { %p517_p4 = scmp.ne.s32.totalorder %s668_s10, %s516_s15  ;;  %p521_p9 = scmp.lt.u32.totalorder %s668_s10, %s715_s5 }
  0xfa   : > { %p522_p10 = scmp.lt.u32.totalorder %s520_s23, %s516_s15  ;;  %p524_p12 = scmp.lt.u32.totalorder %s516_s15, %s668_s10 }
  0xfb   : > { %p518_p7 = pnand %p517_p4, %p637_p5 }
  0xfc   : > { %p523_p11 = por %p522_p10, %p521_p9 }
  0xfd   : > { %p519_p8 = pneg %p518_p7 }
  0xfe   : > { %p525_p13 = por %p524_p12, %p523_p11 }
 0x100   : > { %p526_p0 = pnand %p525_p13, %p519_p8 }
 0x102   : > { %529 = shalt.err (!%p526_p0)
}
 0x103   : > { %459 = dma.vmem_to_hbm [thread:$0]  (%p637_p5), %s670_s8, 256, %s668_s10, %s360_s11  }
 0x104 PF: > { %p465_p1 = scmp.ge.s32.totalorder %s564_s21, 2  ;;  %s386_s6 = sand.u32 1, %s552_s18  }
 0x105   : > { %s387_s7 = scalar_lea.sflag [#allocation3], %s386_s6 }
 0x106   : > { %p462_p2 = pnand %p465_p1, %p641_p6 }
 0x108   : > { %547 = dma.done.wait (!%p462_p2), %s387_s7, 256  }
 0x109   : > { %549 = vsyncadd (!%p462_p2), %s387_s7, 4294967040  ;;  %p15_p3 = scmp.ge.s32.totalorder %s624_s24, 4   ;;  %s718_s18 = smov %s556_s19 }
 0x10a   : > { %s719_s19 = smov %s560_s20  ;;  %s720_s20 = smov %s635_s27 }
 0x10b   : > { %s721_s21 = smov %s624_s24  ;;  %17 = sbr.rel (!%p15_p3) target bundleno = 3 (0x3), region = 78 }
 0x112   :  { %392 = vsyncpa [#allocation3], 1 }
 0x113   :  { %394 = vsyncpa [#allocation3 + $0x1], 1 }

</bundles_post_ra>
